<compile_context>
chip_gen: v6e
topology: v6e:2x2x1
jax: 0.10.0
libtpu: 0.0.40
codegen_flags: <defaults>
</compile_context>

<pallas_src>
import math

import jax
import jax.numpy as jnp
from jax import lax
from jax.experimental import pallas as pl
from jax.experimental.pallas import tpu as pltpu

LANE = 128
SUBLANE = 8


def _round_up(x, m):
    return ((x + m - 1) // m) * m


# --------------------------- fused QKV projection ---------------------------

def _qkv_proj_kernel(x_ref, w_ref, o_ref):
    # x_ref: (tm, d_in); w_ref: (d_in, 3*d_pad); o_ref: (tm, 3*d_pad)
    o_ref[...] = jnp.dot(
        x_ref[...], w_ref[...], preferred_element_type=jnp.float32
    ).astype(o_ref.dtype)


def _qkv_projection(x2d, w_qkv, *, tm):
    M, d_in = x2d.shape
    n_out = w_qkv.shape[1]
    return pl.pallas_call(
        _qkv_proj_kernel,
        out_shape=jax.ShapeDtypeStruct((M, n_out), x2d.dtype),
        grid_spec=pltpu.PrefetchScalarGridSpec(
            num_scalar_prefetch=0,
            grid=(M // tm,),
            in_specs=[
                pl.BlockSpec((tm, d_in), lambda i: (i, 0)),
                # constant index_map -> weight stays resident in VMEM
                pl.BlockSpec((d_in, n_out), lambda i: (0, 0)),
            ],
            out_specs=pl.BlockSpec((tm, n_out), lambda i: (i, 0)),
        ),
        compiler_params=pltpu.CompilerParams(
            dimension_semantics=("parallel",),
            vmem_limit_bytes=32 * 1024 * 1024,
        ),
    )(x2d, w_qkv)


# ----------------------- flash-style causal attention -----------------------

def _flash_causal_kernel(q_ref, k_ref, v_ref, o_ref, m_scr, l_scr, acc_scr):
    # q_ref: (1, tq, d_pad)  k_ref/v_ref: (1, tk, d_pad)  o_ref: (1, tq, d_pad)
    qi = pl.program_id(1)
    ki = pl.program_id(2)
    tq = q_ref.shape[1]
    tk = k_ref.shape[1]

    @pl.when(ki == 0)
    def _init():
        m_scr[...] = jnp.full_like(m_scr, -jnp.inf)
        l_scr[...] = jnp.zeros_like(l_scr)
        acc_scr[...] = jnp.zeros_like(acc_scr)

    q_start = qi * tq
    k_start = ki * tk

    # Skip kv tiles that lie entirely above the causal diagonal (fully masked).
    @pl.when(k_start <= q_start + (tq - 1))
    def _compute():
        q = q_ref[0]            # (tq, d_pad), already scaled by 1/sqrt(d_out)
        k = k_ref[0]            # (tk, d_pad)
        v = v_ref[0]            # (tk, d_pad)

        # scores = q @ k^T without materializing a transpose.
        s = lax.dot_general(
            q, k, (((1,), (1,)), ((), ())), preferred_element_type=jnp.float32
        )                       # (tq, tk)

        # Tile-local causal mask from absolute offsets.
        row = q_start + lax.broadcasted_iota(jnp.int32, (tq, tk), 0)
        col = k_start + lax.broadcasted_iota(jnp.int32, (tq, tk), 1)
        s = jnp.where(col > row, -jnp.inf, s)

        m_prev = m_scr[...]                                        # (tq, 1)
        m_new = jnp.maximum(m_prev, jnp.max(s, axis=-1, keepdims=True))
        alpha = jnp.exp(m_prev - m_new)
        p = jnp.exp(s - m_new)                                     # (tq, tk)

        l_scr[...] = alpha * l_scr[...] + jnp.sum(p, axis=-1, keepdims=True)
        acc_scr[...] = alpha * acc_scr[...] + jnp.dot(
            p.astype(v.dtype), v, preferred_element_type=jnp.float32
        )
        m_scr[...] = m_new

    @pl.when(ki == pl.num_programs(2) - 1)
    def _finalize():
        l = l_scr[...]
        inv = pl.reciprocal(l, approx=True)     # EUP vrcp — off the VALU path
        inv = inv * (2.0 - l * inv)             # one Newton step -> f32 accuracy
        o_ref[0] = (acc_scr[...] * inv).astype(o_ref.dtype)


# --------------------------------- wrapper ----------------------------------

def causal_attention(x, w_query, w_key, w_value, *, seq_tile=256):
    """Causal single-head attention.

    x: (B, T, d_in); w_*: (d_in, d_out)  [pre-transposed nn.Linear weights, W.T].
    Returns (B, T, d_out).
    """
    B, T, d_in = x.shape
    d_out = w_query.shape[1]
    dtype = x.dtype

    # ---- layout / tiling decisions ----
    d_pad = _round_up(max(d_out, LANE), LANE)          # lane-dense feature dim
    tile = min(seq_tile, _round_up(T, SUBLANE))        # q/kv sequence tile
    T_pad = _round_up(T, tile)
    M = B * T_pad
    tm = math.gcd(M, 256)                              # projection M-tile (divides M, mult of 8)

    scale = 1.0 / math.sqrt(d_out)

    def _pad_w(w, s=1.0):
        w = w.astype(dtype) * jnp.asarray(s, dtype)
        return jnp.pad(w, ((0, 0), (0, d_pad - d_out)))

    # Fuse the three projections into a single (d_in, 3*d_pad) weight; fold the
    # 1/sqrt(d_out) softmax scale into the query projection.
    w_qkv = jnp.concatenate(
        [_pad_w(w_query, scale), _pad_w(w_key), _pad_w(w_value)], axis=1
    )

    x_p = jnp.pad(x, ((0, 0), (0, T_pad - T), (0, 0))).astype(dtype)
    x2d = x_p.reshape(M, d_in)

    qkv = _qkv_projection(x2d, w_qkv, tm=tm)           # (M, 3*d_pad)
    qkv = qkv.reshape(B, T_pad, 3 * d_pad)

    n_tiles = T_pad // tile
    grid = (B, n_tiles, n_tiles)                       # kv (reduction) axis last

    out_p = pl.pallas_call(
        _flash_causal_kernel,
        out_shape=jax.ShapeDtypeStruct((B, T_pad, d_pad), dtype),
        grid_spec=pltpu.PrefetchScalarGridSpec(
            num_scalar_prefetch=0,
            grid=grid,
            in_specs=[
                # Q / K / V are three lane-aligned sections of the same fused qkv array.
                pl.BlockSpec((1, tile, d_pad), lambda b, qi, ki: (b, qi, 0)),  # Q
                pl.BlockSpec((1, tile, d_pad), lambda b, qi, ki: (b, ki, 1)),  # K
                pl.BlockSpec((1, tile, d_pad), lambda b, qi, ki: (b, ki, 2)),  # V
            ],
            out_specs=pl.BlockSpec((1, tile, d_pad), lambda b, qi, ki: (b, qi, 0)),
            scratch_shapes=[
                pltpu.VMEM((tile, 1), jnp.float32),       # running max
                pltpu.VMEM((tile, 1), jnp.float32),       # running sum
                pltpu.VMEM((tile, d_pad), jnp.float32),   # output accumulator
            ],
        ),
        compiler_params=pltpu.CompilerParams(
            dimension_semantics=("parallel", "parallel", "arbitrary"),
            vmem_limit_bytes=32 * 1024 * 1024,
        ),
    )(qkv, qkv, qkv)

    return out_p[:, :T, :d_out]


# ------------------------------- reference ----------------------------------

def _reference(x, wq, wk, wv):
    """Plain-JAX reference mirroring the PyTorch forward (eval mode / p=0)."""
    q = x @ wq
    k = x @ wk
    v = x @ wv
    d_out = k.shape[-1]
    scores = jnp.einsum("btd,bsd->bts", q, k)
    T = x.shape[1]
    mask = jnp.triu(jnp.ones((T, T), dtype=bool), k=1)
    scores = jnp.where(mask[None, :, :], -jnp.inf, scores)
    w = jax.nn.softmax(scores / math.sqrt(d_out), axis=-1)
    return w @ v


if __name__ == "__main__":
    # Small shapes consistent with the module: batch=2, seq=8, d_in=32, d_out=32
    B, T, d_in, d_out = 2, 8, 32, 32
    dropout = 0.0  # identity — matches PyTorch eval mode / p=0

    key = jax.random.PRNGKey(0)
    kx, kq, kk, kv = jax.random.split(key, 4)

    x = jax.random.normal(kx, (B, T, d_in), dtype=jnp.float32)
    # Deterministic "Linear" weights, stored as (d_in, d_out) == W.T of nn.Linear
    bound = 1.0 / math.sqrt(d_in)
    w_query = jax.random.uniform(kq, (d_in, d_out), jnp.float32, -bound, bound)
    w_key = jax.random.uniform(kk, (d_in, d_out), jnp.float32, -bound, bound)
    w_value = jax.random.uniform(kv, (d_in, d_out), jnp.float32, -bound, bound)

    out = causal_attention(x, w_query, w_key, w_value)
    out = jax.block_until_ready(out)

    ref = _reference(x, w_query, w_key, w_value)
    assert out.shape == (B, T, d_out)
    assert jnp.allclose(out, ref, atol=2e-5, rtol=2e-5), "mismatch vs reference"

    print("KERNEL_OK")
</pallas_src>

<mosaic_0001>
module attributes {stable_mosaic.version = 11 : i64} {
  func.func @_qkv_proj_kernel(%arg0: i32, %arg1: memref<16x32xf32, #tpu.memory_space<vmem>>, %arg2: memref<32x384xf32, #tpu.memory_space<vmem>>, %arg3: memref<16x384xf32, #tpu.memory_space<vmem>>) attributes {dimension_semantics = [#tpu.dimension_semantics<parallel>], iteration_bounds = array<i64: 1>, scalar_prefetch = 0 : i64, scratch_operands = 0 : i64, tpu.core_type = #tpu.core_type<tc>, window_params = [{transform_indices = @transform_0, window_bounds = array<i64: 16, 32>}, {pipeline_mode = #tpu.pipeline_mode<synchronous>, transform_indices = @transform_1, window_bounds = array<i64: 32, 384>}, {transform_indices = @transform_2, window_bounds = array<i64: 16, 384>}]} {
    %c0 = arith.constant 0 : index
    %c0_0 = arith.constant 0 : index
    %0 = vector.load %arg1[%c0, %c0_0] : memref<16x32xf32, #tpu.memory_space<vmem>>, vector<16x32xf32>
    %c0_1 = arith.constant 0 : index
    %c0_2 = arith.constant 0 : index
    %1 = vector.load %arg2[%c0_1, %c0_2] : memref<32x384xf32, #tpu.memory_space<vmem>>, vector<32x384xf32>
    %cst = arith.constant dense<0.000000e+00> : vector<16x384xf32>
    %2 = tpu.matmul %0, %1, %cst {dimension_numbers = #tpu.dot_dimension_numbers<[1], [0], [0], [1], [0, 0, 1, 1], [], []>} : vector<16x32xf32>, vector<32x384xf32>, vector<16x384xf32> -> vector<16x384xf32>
    %c0_3 = arith.constant 0 : index
    %c0_4 = arith.constant 0 : index
    %3 = vector.load %arg3[%c0_3, %c0_4] : memref<16x384xf32, #tpu.memory_space<vmem>>, vector<16x384xf32>
    tpu.vector_store %arg3[%c0_3, %c0_4], %2 {strides = array<i32>} : memref<16x384xf32, #tpu.memory_space<vmem>>, vector<16x384xf32>,
    return
  }
  func.func @transform_0(%arg0: i32) -> (i32, i32) {
    %c0_i32 = arith.constant 0 : i32
    %c0_i32_0 = arith.constant 0 : i32
    return %arg0, %c0_i32 : i32, i32
  }
  func.func @transform_1(%arg0: i32) -> (i32, i32) {
    %c0_i32 = arith.constant 0 : i32
    %c0_i32_0 = arith.constant 0 : i32
    %c0_i32_1 = arith.constant 0 : i32
    return %c0_i32, %c0_i32_0 : i32, i32
  }
  func.func @transform_2(%arg0: i32) -> (i32, i32) {
    %c0_i32 = arith.constant 0 : i32
    %c0_i32_0 = arith.constant 0 : i32
    return %arg0, %c0_i32 : i32, i32
  }
}

</mosaic_0001>

<bundles_post_ra>
// kernel: tpu_custom_call.1
= control target key start
LH: loop header
LB: loop body
LE: loop exit
PB: predicated region body
PF: predicated region fallthrough
CT: control target
= control target key end

     0   :  { %7 = vsyncpa [#allocation3], 0  ;;  %s370_s0 = inlined_call_operand.hbm [shape: f32[16,32], index: 0, kind: input, shape index: {}]   ;;  %s371_s1 = inlined_call_operand.hbm [shape: f32[32,384], index: 1, kind: input, shape index: {}]   ;;  %s372_s2 = inlined_call_operand.hbm [shape: f32[16,384], index: 2, kind: output, shape index: {}]  }
   0x1   :  { %8 = vsyncpa [#allocation6], 0 }
   0x2   :  { %9 = vsyncpa [#allocation4], 0  ;;  %s332_s9 = smov [#allocation2]  }
   0x3   :  { %s15_s10 = sshll.u32 %s332_s9, 4  ;;  %s16_s10 = int_to_ptr.vmem [resolvable:$true] %s15_s10 }
   0x4   :  { %s274_s11 = scalar_lea.vmem %s16_s10, 256  ;;  %p279_p1 = scmp.lt.s32.totalorder %s16_s10, %s16_s10 }
   0x5   :  { %p275_p0 = scmp.ne.s32.totalorder %s16_s10, %s274_s11  ;;  %p280_p2 = scmp.lt.s32.totalorder %s274_s11, %s274_s11 }
   0x7   :  { %p281_p3 = por %p280_p2, %p279_p1 }
   0x9   :  { %p282_p4 = pnand %p281_p3, %p275_p0 }
   0xb   :  { %285 = shalt.err (!%p282_p4)
}
   0xc   :  { %s333_s12 = smov 128   ;;  %s334_s13 = smov 8  }
   0xd   :  { %21 = dma.hbm_to_vmem [thread:$0]  %s370_s0, 256, %s16_s10, [#allocation3], %s333_s12, %s333_s12, %s334_s13  }
   0xe   :  { %s335_s16 = smov [#allocation5]  }
   0xf   :  { %s27_s17 = sshll.u32 %s335_s16, 4  ;;  %s28_s17 = int_to_ptr.vmem [resolvable:$true] %s27_s17 }
  0x10   :  { %s294_s18 = scalar_lea.vmem %s28_s17, 1536  ;;  %p299_p6 = scmp.lt.s32.totalorder %s28_s17, %s28_s17 }
  0x11   :  { %p295_p5 = scmp.ne.s32.totalorder %s28_s17, %s294_s18  ;;  %p300_p7 = scmp.lt.s32.totalorder %s294_s18, %s294_s18 }
  0x13   :  { %p301_p8 = por %p300_p7, %p299_p6 }
  0x15   :  { %p302_p9 = pnand %p301_p8, %p295_p5 }
  0x17   :  { %305 = shalt.err (!%p302_p9)
}
  0x18   :  { %s336_s19 = smov 384   ;;  %s337_s20 = smov 24  }
  0x19   :  { %33 = dma.hbm_to_vmem [thread:$0]  %s371_s1, 1536, %s28_s17, [#allocation6], %s336_s19, %s336_s19, %s337_s20  }
  0x1a   :  { %326 = dma.done.wait [#allocation3], 256  }
  0x1b   :  { %327 = vsyncadd [#allocation3], 4294967040 }
  0x1c   :  { %328 = dma.done.wait [#allocation6], 1536  }
  0x1d   :  { %329 = vsyncadd [#allocation6], 4294965760  ;;  %v338_v0 = vmov 0.0   ;;  %v52_v1 = vld [vmem:[#allocation5 + $0x50] sm:$0xff]  ;;  %v51_v2 = vld [vmem:[#allocation5 + $0x48] sm:$0xff]  ;;  %vm54_vm0 = vcmask 261120  }
  0x1e   :  { %125 = vmatprep.mubr.f32.mxu0 %v338_v0  ;;  %v49_v3 = vld [vmem:[#allocation5 + $0x38] sm:$0xff]  ;;  %85 = vmatprep.subr.mxu0 %v52_v1  ;;  %v48_v5 = vld [vmem:[#allocation5 + $0x30] sm:$0xff]  ;;  %v46_v6 = vld [vmem:[#allocation5 + $0x20] sm:$0xff]  ;;  %s339_s0 = smov [#allocation7]  }
  0x1f   :  { %v53_v4 = vld [vmem:[#allocation5 + $0x58] sm:$0xff]  ;;  %86 = vmatpush1.msra.mxu0 %v51_v2  ;;  %v50_v7 = vld [vmem:[#allocation5 + $0x40] sm:$0xff]  ;;  %v47_v9 = vld [vmem:[#allocation5 + $0x28] sm:$0xff]  ;;  %s224_s1 = sshll.u32 %s339_s0, 4  ;;  %s225_s1 = int_to_ptr.vmem [resolvable:$true] %s224_s1 }
  0x20   :  { %247 = vmatprep.subr.mxu1 %v53_v4  ;;  %87 = vmatprep.subr.mxu0 %v49_v3  ;;  %v45_v8 = vld [vmem:[#allocation5 + $0x18] sm:$0xff]  ;;  %v43_v10 = vld [vmem:[#allocation5 + $0x8] sm:$0xff]  ;;  %v42_v11 = vld [vmem:[#allocation5] sm:$0xff]  ;;  %s306_s23 = scalar_lea.vmem %s225_s1, 768  ;;  %p311_p11 = scmp.lt.s32.totalorder %s225_s1, %s225_s1 }
  0x21   :  { %248 = vmatpush3.msra.mxu1 %v53_v4  ;;  %88 = vmatpush1.msra.mxu0 %v48_v5  ;;  %v44_v12 = vld [vmem:[#allocation5 + $0x10] sm:$0xff]  ;;  %v41_v14 = vld [vmem:[#allocation2 + $0x8] sm:$0xff]  ;;  %p307_p10 = scmp.ne.s32.totalorder %s225_s1, %s306_s23  ;;  %p312_p12 = scmp.lt.s32.totalorder %s306_s23, %s306_s23 }
  0x22   :  { %249 = vmatprep.subr.mxu1 %v50_v7  ;;  %89 = vmatprep.subr.mxu0 %v46_v6  ;;  %v40_v13 = vld [vmem:[#allocation2] sm:$0xff] }
  0x23   :  { %250 = vmatpush3.msra.mxu1 %v50_v7  ;;  %90 = vmatpush1.msra.mxu0 %v45_v8  ;;  %p313_p13 = por %p312_p12, %p311_p11 }
  0x24   :  { %251 = vmatprep.subr.mxu1 %v47_v9  ;;  %91 = vmatprep.subr.mxu0 %v43_v10 }
  0x25   :  { %252 = vmatpush3.msra.mxu1 %v47_v9  ;;  %92 = vmatpush1.msra.mxu0 %v42_v11  ;;  %p314_p0 = pnand %p313_p13, %p307_p10 }
  0x26   :  { %253 = vmatprep.subr.mxu1 %v44_v12  ;;  %237 = vmatmul.mubr.msk.f32.vlgmr.msra.gmra.mxu0 %vm54_vm0, %v40_v13 }
  0x27   :  { %254 = vmatpush3.msra.mxu1 %v44_v12  ;;  %255 = vmatprep.mubr.msk.f32.mxu1 %vm54_vm0, %v40_v13 }
  0x28   :  { %131 = vmatprep.mubr.f32.mxu0 %v338_v0  ;;  %256 = vmatmul.mubr.msk.f32.vlgmr.msra.gmra.mxu1 %vm54_vm0, %v41_v14 }
  0x2a   :  { %238 = vmatmul.mubr.msk.f32.gmra.mxu0 %vm54_vm0, %v41_v14 }
  0xe6   :  { %v127_v15 = vpop.f32.mrf.mxu0 }
  0xe7   :  { %213 = vst [vmem:[#allocation7] sm:$0xff] %v127_v15 }
  0xe8   :  { %v129_v16 = vpop.f32.mrf.mxu0  ;;  %v257_v17 = vpop.f32.mrf.mxu1 }
  0xe9   :  { %214 = vst [vmem:[#allocation7 + $0x8] sm:$0xff] %v129_v16  ;;  %218 = vst [vmem:[#allocation7 + $0x28] sm:$0xff] %v257_v17 }
  0xea   :  { %v133_v18 = vpop.f32.mrf.mxu0  ;;  %v204_v19 = vpop.f32.mrf.mxu1 }
  0xeb   :  { %216 = vst [vmem:[#allocation7 + $0x18] sm:$0xff] %v133_v18  ;;  %215 = vst [vmem:[#allocation7 + $0x10] sm:$0xff] %v204_v19 }
  0xec   :  { %v135_v20 = vpop.f32.mrf.mxu0 }
  0xed   :  { %217 = vst [vmem:[#allocation7 + $0x20] sm:$0xff] %v135_v20 }
  0xee   :  { %317 = shalt.err (!%p314_p0)
}
  0xef   :  { %230 = dma.vmem_to_hbm [thread:$0]  %s225_s1, 768, %s372_s2, [#allocation4], %s336_s19, %s336_s19, %s337_s20  }
  0xf0   :  { %330 = dma.done.wait [#allocation4], 768  }
  0xf1   :  { %331 = vsyncadd [#allocation4], 4294966528 }
  0xf2   :  { %234 = vsyncpa [#allocation3], 1 }
  0xf3   :  { %235 = vsyncpa [#allocation6], 1 }
  0xf4   :  { %236 = vsyncpa [#allocation4], 1 }

</bundles_post_ra>
